<compile_context>
chip_gen: v7x
topology: tpu7x:2x2x1
jax: 0.10.0
libtpu: 0.0.40
codegen_flags: <defaults>
</compile_context>

<pallas_src>
import functools
import math

import jax
import jax.numpy as jnp
from jax import lax
from jax.experimental import pallas as pl
from jax.experimental.pallas import tpu as pltpu


# ------------------------------ helpers --------------------------------------

def _vmem_capacity_bytes():
    """Physical VMEM per core (128 MiB v5e/v6e, 64 MiB v7x); safe fallback."""
    try:
        info = pltpu.get_tpu_info()
        cap = getattr(info, "vmem_capacity_bytes", None)
        if cap:
            return int(cap)
    except Exception:
        pass
    return 64 * 1024 * 1024


def _packed_scale_shift(sum_vec, sumsq_vec, gamma_vec, beta_vec, *,
                        group, channels, inv_count, eps):
    """Fold per-lane stats into lane-packed (1, Dp) scale/shift.

    Lane l = p*channels + d holds channel d (lane group p).  Per-channel
    totals (replicated to every lane group) are the sum of the `group`
    cyclic lane-rolls by multiples of `channels` -- pure XLU work, no
    lane<->sublane reshape.  Returns scale/shift so that y = added*scale+shift.
    """
    tot_s, tot_q = sum_vec, sumsq_vec
    for k in range(1, group):
        tot_s = tot_s + pltpu.roll(sum_vec, k * channels, 1)
        tot_q = tot_q + pltpu.roll(sumsq_vec, k * channels, 1)
    mean = tot_s * inv_count
    var = jnp.maximum(tot_q * inv_count - mean * mean, 0.0)  # clamp cancellation
    scale = gamma_vec * lax.rsqrt(var + eps)
    shift = beta_vec - mean * scale
    return scale, shift


# --------------------------- fused (resident) kernel --------------------------

def _fused_kernel(x1_ref, x2_ref, gamma_ref, beta_ref, o_ref,
                  added_ref, sum_ref, sumsq_ref, scale_ref, shift_ref, *,
                  nblocks, block_rows, valid_rows, group, channels,
                  inv_count, eps, needs_mask):
    ph = pl.program_id(0)      # 0: add + stats (fills VMEM cache), 1: normalize
    i = pl.program_id(1)       # row-block index

    row0 = i * block_rows
    if block_rows % 8 == 0:
        row0 = pl.multiple_of(row0, 8)

    @pl.when(ph == 0)
    def _stats_phase():
        added = (x1_ref[...].astype(jnp.float32) +
                 x2_ref[...].astype(jnp.float32))             # (TR, Dp) f32
        added_ref[pl.ds(row0, block_rows), :] = added          # persistent cache

        @pl.when(i == 0)
        def _init():
            sum_ref[...] = jnp.zeros_like(sum_ref)
            sumsq_ref[...] = jnp.zeros_like(sumsq_ref)

        def _acc(a):
            sum_ref[...] += jnp.sum(a, axis=0, keepdims=True)
            sumsq_ref[...] += jnp.sum(a * a, axis=0, keepdims=True)

        if needs_mask:
            # Mask only the single partial block; all other blocks unmasked.
            @pl.when(i < nblocks - 1)
            def _full():
                _acc(added)

            @pl.when(i == nblocks - 1)
            def _partial():
                rid = i * block_rows + lax.broadcasted_iota(
                    jnp.int32, added.shape, 0)
                _acc(jnp.where(rid < valid_rows, added, 0.0))
        else:
            _acc(added)

    @pl.when(ph == 1)
    def _apply_phase():
        @pl.when(i == 0)
        def _finalize():
            scale, shift = _packed_scale_shift(
                sum_ref[...], sumsq_ref[...], gamma_ref[...], beta_ref[...],
                group=group, channels=channels, inv_count=inv_count, eps=eps)
            scale_ref[...] = scale
            shift_ref[...] = shift

        a = added_ref[pl.ds(row0, block_rows), :]
        o_ref[...] = (a * scale_ref[...] + shift_ref[...]).astype(o_ref.dtype)


# --------------------------- two-call (streaming) kernels ---------------------

def _stats_kernel(x1_ref, x2_ref, sum_ref, sumsq_ref, *,
                  nblocks, block_rows, valid_rows, needs_mask):
    i = pl.program_id(0)

    @pl.when(i == 0)
    def _init():
        sum_ref[...] = jnp.zeros_like(sum_ref)
        sumsq_ref[...] = jnp.zeros_like(sumsq_ref)

    added = (x1_ref[...].astype(jnp.float32) +
             x2_ref[...].astype(jnp.float32))

    def _acc(a):
        sum_ref[...] += jnp.sum(a, axis=0, keepdims=True)
        sumsq_ref[...] += jnp.sum(a * a, axis=0, keepdims=True)

    if needs_mask:
        @pl.when(i < nblocks - 1)
        def _full():
            _acc(added)

        @pl.when(i == nblocks - 1)
        def _partial():
            rid = i * block_rows + lax.broadcasted_iota(
                jnp.int32, added.shape, 0)
            _acc(jnp.where(rid < valid_rows, added, 0.0))
    else:
        _acc(added)


def _apply_kernel(sum_ref, sumsq_ref, gamma_ref, beta_ref, x1_ref, x2_ref,
                  o_ref, *, group, channels, inv_count, eps):
    # Per-block recompute of scale/shift from the tiny resident (1, Dp) stats:
    # negligible vs. the (TR, Dp) FMA and keeps the block axis "parallel"-safe.
    scale, shift = _packed_scale_shift(
        sum_ref[...], sumsq_ref[...], gamma_ref[...], beta_ref[...],
        group=group, channels=channels, inv_count=inv_count, eps=eps)
    added = (x1_ref[...].astype(jnp.float32) +
             x2_ref[...].astype(jnp.float32))
    o_ref[...] = (added * scale + shift).astype(o_ref.dtype)


# --------------------------------- wrapper ------------------------------------

def add_and_batch_norm(input1, input2, gamma, beta, *, eps=1e-5,
                       max_block_rows=None, force_two_pass=False):
    """Pallas TPU implementation of AddAndBatchNormalization.forward.

    input1, input2: (B, N, D); gamma, beta: (D,).  Returns (B, N, D).
    """
    assert input1.shape == input2.shape
    B, N, D = input1.shape
    R = B * N
    out_dtype = input1.dtype

    # --- lane packing: fold P consecutive rows into the lane axis so kernel
    #     blocks are (rows, P*D) with P*D a multiple of 128 lanes. ---
    P = 128 // math.gcd(D, 128)
    R_pad = ((R + P - 1) // P) * P
    x1 = input1.reshape(R, D)
    x2 = input2.reshape(R, D)
    if R_pad != R:
        # Zero rows add nothing to sum / sum-of-squares (divide by true R);
        # padded output rows are sliced off below.
        x1 = jnp.pad(x1, ((0, R_pad - R), (0, 0)))
        x2 = jnp.pad(x2, ((0, R_pad - R), (0, 0)))
    Rp, Dp = R_pad // P, D * P
    x1 = x1.reshape(Rp, Dp)
    x2 = x2.reshape(Rp, Dp)

    gamma_p = jnp.tile(gamma.astype(jnp.float32).reshape(1, D), (1, P))
    beta_p = jnp.tile(beta.astype(jnp.float32).reshape(1, D), (1, P))

    # --- generation-aware tile sizing (v5e/v6e: 128 MiB VMEM, v7x: 64 MiB) ---
    cap = _vmem_capacity_bytes()
    row_bytes = Dp * 4
    tr = (cap // 5) // (6 * row_bytes)          # x1, x2, out, double-buffered
    tr = min(tr, 4096)
    if max_block_rows is not None:
        tr = min(tr, int(max_block_rows))
    tr = max(tr, 8)
    tr = (tr // 8) * 8
    TR = min(Rp, tr)
    nblocks = pl.cdiv(Rp, TR)
    needs_mask = (nblocks * TR) != Rp

    cache_bytes = nblocks * TR * row_bytes
    pipe_bytes = 6 * TR * row_bytes             # 3 row operands x 2 buffers
    resident = (not force_two_pass) and (
        cache_bytes + pipe_bytes + (2 << 20) <= int(cap * 0.5))

    est = pipe_bytes + (cache_bytes if resident else 0) + (8 << 20)
    vmem_limit = min(int(cap * 0.85), max(est + (8 << 20), 32 << 20))

    inv_count = 1.0 / R

    if resident:
        # ---------------- single fused call, `added` cached in VMEM ----------
        row_in_map = lambda ph, i: (i * (1 - ph) + (nblocks - 1) * ph, 0)
        out_map = lambda ph, i: (i * ph, 0)
        vec_map = lambda ph, i: (0, 0)

        out_packed = pl.pallas_call(
            functools.partial(
                _fused_kernel, nblocks=nblocks, block_rows=TR, valid_rows=Rp,
                group=P, channels=D, inv_count=inv_count, eps=eps,
                needs_mask=needs_mask),
            out_shape=jax.ShapeDtypeStruct((Rp, Dp), out_dtype),
            grid_spec=pltpu.PrefetchScalarGridSpec(
                num_scalar_prefetch=0,
                grid=(2, nblocks),
                in_specs=[
                    pl.BlockSpec((TR, Dp), row_in_map),
                    pl.BlockSpec((TR, Dp), row_in_map),
                    pl.BlockSpec((1, Dp), vec_map),
                    pl.BlockSpec((1, Dp), vec_map),
                ],
                out_specs=pl.BlockSpec((TR, Dp), out_map),
                scratch_shapes=[
                    pltpu.VMEM((nblocks * TR, Dp), jnp.float32),  # added cache
                    pltpu.VMEM((1, Dp), jnp.float32),             # sum
                    pltpu.VMEM((1, Dp), jnp.float32),             # sumsq
                    pltpu.VMEM((1, Dp), jnp.float32),             # scale
                    pltpu.VMEM((1, Dp), jnp.float32),             # shift
                ],
            ),
            compiler_params=pltpu.CompilerParams(
                dimension_semantics=("arbitrary", "arbitrary"),
                vmem_limit_bytes=vmem_limit),
        )(x1, x2, gamma_p, beta_p)
    else:
        # ---------------- two-call streaming path for large inputs -----------
        row_spec = pl.BlockSpec((TR, Dp), lambda i: (i, 0))
        vec_spec = pl.BlockSpec((1, Dp), lambda i: (0, 0))

        lane_sum, lane_sumsq = pl.pallas_call(
            functools.partial(
                _stats_kernel, nblocks=nblocks, block_rows=TR, valid_rows=Rp,
                needs_mask=needs_mask),
            out_shape=(jax.ShapeDtypeStruct((1, Dp), jnp.float32),
                       jax.ShapeDtypeStruct((1, Dp), jnp.float32)),
            grid_spec=pltpu.PrefetchScalarGridSpec(
                num_scalar_prefetch=0,
                grid=(nblocks,),
                in_specs=[row_spec, row_spec],
                out_specs=(vec_spec, vec_spec),
            ),
            compiler_params=pltpu.CompilerParams(
                dimension_semantics=("arbitrary",),   # resident accumulators
                vmem_limit_bytes=vmem_limit),
        )(x1, x2)

        out_packed = pl.pallas_call(
            functools.partial(
                _apply_kernel, group=P, channels=D, inv_count=inv_count,
                eps=eps),
            out_shape=jax.ShapeDtypeStruct((Rp, Dp), out_dtype),
            grid_spec=pltpu.PrefetchScalarGridSpec(
                num_scalar_prefetch=0,
                grid=(nblocks,),
                in_specs=[vec_spec, vec_spec, vec_spec, vec_spec,
                          row_spec, row_spec],
                out_specs=row_spec,
            ),
            compiler_params=pltpu.CompilerParams(
                dimension_semantics=("parallel",),    # megacore-shardable
                vmem_limit_bytes=vmem_limit),
        )(lane_sum, lane_sumsq, gamma_p, beta_p, x1, x2)

    out = out_packed.reshape(R_pad, D)
    if R_pad != R:
        out = out[:R]
    return out.reshape(B, N, D)


# ----------------------------- pure-JAX reference -----------------------------

def add_and_batch_norm_reference(input1, input2, gamma, beta, eps=1e-5):
    B, N, D = input1.shape
    added = (input1 + input2).reshape(B * N, D).astype(jnp.float32)
    mean = jnp.mean(added, axis=0, keepdims=True)
    var = jnp.mean((added - mean) ** 2, axis=0, keepdims=True)
    y = (added - mean) * lax.rsqrt(var + eps)
    y = gamma.reshape(1, D) * y + beta.reshape(1, D)
    return y.reshape(B, N, D).astype(input1.dtype)


# ------------------------------------ main -------------------------------------

if __name__ == "__main__":
    B, N, D = 2, 8, 32          # batch, problem size (seq), embedding_dim
    key = jax.random.PRNGKey(0)
    k1, k2, k3, k4 = jax.random.split(key, 4)

    input1 = jax.random.normal(k1, (B, N, D), jnp.float32)
    input2 = jax.random.normal(k2, (B, N, D), jnp.float32)
    gamma = (1.0 + 0.1 * jax.random.normal(k3, (D,))).astype(jnp.float32)
    beta = (0.1 * jax.random.normal(k4, (D,))).astype(jnp.float32)

    # 1) default fused resident path
    out = jax.block_until_ready(add_and_batch_norm(input1, input2, gamma, beta))
    ref = add_and_batch_norm_reference(input1, input2, gamma, beta)
    assert out.shape == (B, N, D)
    err = float(jnp.max(jnp.abs(out - ref)))
    assert jnp.allclose(out, ref, atol=1e-4, rtol=1e-4), err

    # 2) fused path with multiple row blocks + masked partial last block
    B2, N2 = 4, 10                              # Rp = 10 packed rows, TR = 8
    i1 = jax.random.normal(k1, (B2, N2, D), jnp.float32)
    i2 = jax.random.normal(k2, (B2, N2, D), jnp.float32)
    out2 = jax.block_until_ready(
        add_and_batch_norm(i1, i2, gamma, beta, max_block_rows=8))
    ref2 = add_and_batch_norm_reference(i1, i2, gamma, beta)
    err2 = float(jnp.max(jnp.abs(out2 - ref2)))
    assert jnp.allclose(out2, ref2, atol=1e-4, rtol=1e-4), err2

    # 3) ragged R (zero-row padding) + forced two-call streaming path with a
    #    multi-block masked reduction
    B3, N3 = 2, 25                              # R = 50 -> pad 52, Rp = 13
    i1 = jax.random.normal(k1, (B3, N3, D), jnp.float32)
    i2 = jax.random.normal(k2, (B3, N3, D), jnp.float32)
    out3 = jax.block_until_ready(
        add_and_batch_norm(i1, i2, gamma, beta, max_block_rows=8,
                           force_two_pass=True))
    ref3 = add_and_batch_norm_reference(i1, i2, gamma, beta)
    err3 = float(jnp.max(jnp.abs(out3 - ref3)))
    assert jnp.allclose(out3, ref3, atol=1e-4, rtol=1e-4), err3

    print("KERNEL_OK")
</pallas_src>

<mosaic_0001>
module attributes {stable_mosaic.version = 11 : i64} {
  func.func @_fused_kernel(%arg0: i32, %arg1: i32, %arg2: memref<4x128xf32, #tpu.memory_space<vmem>>, %arg3: memref<4x128xf32, #tpu.memory_space<vmem>>, %arg4: memref<1x128xf32, #tpu.memory_space<vmem>>, %arg5: memref<1x128xf32, #tpu.memory_space<vmem>>, %arg6: memref<4x128xf32, #tpu.memory_space<vmem>>, %arg7: memref<4x128xf32, #tpu.memory_space<vmem>>, %arg8: memref<1x128xf32, #tpu.memory_space<vmem>>, %arg9: memref<1x128xf32, #tpu.memory_space<vmem>>, %arg10: memref<1x128xf32, #tpu.memory_space<vmem>>, %arg11: memref<1x128xf32, #tpu.memory_space<vmem>>) attributes {dimension_semantics = [#tpu.dimension_semantics<arbitrary>, #tpu.dimension_semantics<arbitrary>], iteration_bounds = array<i64: 2, 1>, scalar_prefetch = 0 : i64, scratch_operands = 5 : i64, tpu.core_type = #tpu.core_type<tc>, window_params = [{transform_indices = @transform_0, window_bounds = array<i64: 4, 128>}, {transform_indices = @transform_1, window_bounds = array<i64: 4, 128>}, {pipeline_mode = #tpu.pipeline_mode<synchronous>, transform_indices = @transform_2, window_bounds = array<i64: 1, 128>}, {pipeline_mode = #tpu.pipeline_mode<synchronous>, transform_indices = @transform_3, window_bounds = array<i64: 1, 128>}, {transform_indices = @transform_4, window_bounds = array<i64: 4, 128>}]} {
    %c4_i32 = arith.constant 4 : i32
    %0 = arith.muli %arg1, %c4_i32 : i32
    %c0_i32 = arith.constant 0 : i32
    %1 = arith.cmpi eq, %arg0, %c0_i32 : i32
    %2 = arith.extui %1 : i1 to i32
    %c0_i32_0 = arith.constant 0 : i32
    %3 = arith.cmpi ne, %2, %c0_i32_0 : i32
    scf.if %3 {
      %c0 = arith.constant 0 : index
      %c0_2 = arith.constant 0 : index
      %7 = vector.load %arg2[%c0, %c0_2] : memref<4x128xf32, #tpu.memory_space<vmem>>, vector<4x128xf32>
      %c0_3 = arith.constant 0 : index
      %c0_4 = arith.constant 0 : index
      %8 = vector.load %arg3[%c0_3, %c0_4] : memref<4x128xf32, #tpu.memory_space<vmem>>, vector<4x128xf32>
      %9 = arith.addf %7, %8 : vector<4x128xf32>
      %10 = arith.index_cast %0 : i32 to index
      %c0_5 = arith.constant 0 : index
      %11 = vector.load %arg7[%10, %c0_5] : memref<4x128xf32, #tpu.memory_space<vmem>>, vector<4x128xf32>
      tpu.vector_store %arg7[%10, %c0_5], %9 {strides = array<i32>} : memref<4x128xf32, #tpu.memory_space<vmem>>, vector<4x128xf32>,
      %c0_i32_6 = arith.constant 0 : i32
      %12 = arith.cmpi eq, %arg1, %c0_i32_6 : i32
      %13 = arith.extui %12 : i1 to i32
      %c0_i32_7 = arith.constant 0 : i32
      %14 = arith.cmpi ne, %13, %c0_i32_7 : i32
      scf.if %14 {
        %cst_17 = arith.constant 0.000000e+00 : f32
        %26 = vector.broadcast %cst_17 : f32 to vector<1x128xf32>
        %c0_18 = arith.constant 0 : index
        %c0_19 = arith.constant 0 : index
        %27 = vector.load %arg8[%c0_18, %c0_19] : memref<1x128xf32, #tpu.memory_space<vmem>>, vector<1x128xf32>
        tpu.vector_store %arg8[%c0_18, %c0_19], %26 {strides = array<i32>} : memref<1x128xf32, #tpu.memory_space<vmem>>, vector<1x128xf32>,
        %cst_20 = arith.constant 0.000000e+00 : f32
        %28 = vector.broadcast %cst_20 : f32 to vector<1x128xf32>
        %c0_21 = arith.constant 0 : index
        %c0_22 = arith.constant 0 : index
        %29 = vector.load %arg9[%c0_21, %c0_22] : memref<1x128xf32, #tpu.memory_space<vmem>>, vector<1x128xf32>
        tpu.vector_store %arg9[%c0_21, %c0_22], %28 {strides = array<i32>} : memref<1x128xf32, #tpu.memory_space<vmem>>, vector<1x128xf32>,
      } else {
      }
      %c0_8 = arith.constant 0 : index
      %c0_9 = arith.constant 0 : index
      %15 = vector.load %arg8[%c0_8, %c0_9] : memref<1x128xf32, #tpu.memory_space<vmem>>, vector<1x128xf32>
      %cst = arith.constant dense<0.000000e+00> : vector<128xf32>
      %16 = vector.multi_reduction <add>, %9, %cst [0] : vector<4x128xf32> to vector<128xf32>
      %17 = vector.shape_cast %16 : vector<128xf32> to vector<1x128xf32>
      %18 = arith.addf %15, %17 : vector<1x128xf32>
      %c0_10 = arith.constant 0 : index
      %c0_11 = arith.constant 0 : index
      %19 = vector.load %arg8[%c0_10, %c0_11] : memref<1x128xf32, #tpu.memory_space<vmem>>, vector<1x128xf32>
      tpu.vector_store %arg8[%c0_10, %c0_11], %18 {strides = array<i32>} : memref<1x128xf32, #tpu.memory_space<vmem>>, vector<1x128xf32>,
      %c0_12 = arith.constant 0 : index
      %c0_13 = arith.constant 0 : index
      %20 = vector.load %arg9[%c0_12, %c0_13] : memref<1x128xf32, #tpu.memory_space<vmem>>, vector<1x128xf32>
      %21 = arith.mulf %9, %9 : vector<4x128xf32>
      %cst_14 = arith.constant dense<0.000000e+00> : vector<128xf32>
      %22 = vector.multi_reduction <add>, %21, %cst_14 [0] : vector<4x128xf32> to vector<128xf32>
      %23 = vector.shape_cast %22 : vector<128xf32> to vector<1x128xf32>
      %24 = arith.addf %20, %23 : vector<1x128xf32>
      %c0_15 = arith.constant 0 : index
      %c0_16 = arith.constant 0 : index
      %25 = vector.load %arg9[%c0_15, %c0_16] : memref<1x128xf32, #tpu.memory_space<vmem>>, vector<1x128xf32>
      tpu.vector_store %arg9[%c0_15, %c0_16], %24 {strides = array<i32>} : memref<1x128xf32, #tpu.memory_space<vmem>>, vector<1x128xf32>,
    } else {
    }
    %c1_i32 = arith.constant 1 : i32
    %4 = arith.cmpi eq, %arg0, %c1_i32 : i32
    %5 = arith.extui %4 : i1 to i32
    %c0_i32_1 = arith.constant 0 : i32
    %6 = arith.cmpi ne, %5, %c0_i32_1 : i32
    scf.if %6 {
      %c0_i32_2 = arith.constant 0 : i32
      %7 = arith.cmpi eq, %arg1, %c0_i32_2 : i32
      %8 = arith.extui %7 : i1 to i32
      %c0_i32_3 = arith.constant 0 : i32
      %9 = arith.cmpi ne, %8, %c0_i32_3 : i32
      scf.if %9 {
        %c0_10 = arith.constant 0 : index
        %c0_11 = arith.constant 0 : index
        %19 = vector.load %arg8[%c0_10, %c0_11] : memref<1x128xf32, #tpu.memory_space<vmem>>, vector<1x128xf32>
        %c0_12 = arith.constant 0 : index
        %c0_13 = arith.constant 0 : index
        %20 = vector.load %arg9[%c0_12, %c0_13] : memref<1x128xf32, #tpu.memory_space<vmem>>, vector<1x128xf32>
        %c0_14 = arith.constant 0 : index
        %c0_15 = arith.constant 0 : index
        %21 = vector.load %arg4[%c0_14, %c0_15] : memref<1x128xf32, #tpu.memory_space<vmem>>, vector<1x128xf32>
        %c0_16 = arith.constant 0 : index
        %c0_17 = arith.constant 0 : index
        %22 = vector.load %arg5[%c0_16, %c0_17] : memref<1x128xf32, #tpu.memory_space<vmem>>, vector<1x128xf32>
        %c32_i32 = arith.constant 32 : i32
        %23 = tpu.dynamic_rotate %19 by %c32_i32 dim 1 : vector<1x128xf32>, i32 -> vector<1x128xf32>
        %24 = arith.addf %19, %23 : vector<1x128xf32>
        %c32_i32_18 = arith.constant 32 : i32
        %25 = tpu.dynamic_rotate %20 by %c32_i32_18 dim 1 : vector<1x128xf32>, i32 -> vector<1x128xf32>
        %26 = arith.addf %20, %25 : vector<1x128xf32>
        %c64_i32 = arith.constant 64 : i32
        %27 = tpu.dynamic_rotate %19 by %c64_i32 dim 1 : vector<1x128xf32>, i32 -> vector<1x128xf32>
        %28 = arith.addf %24, %27 : vector<1x128xf32>
        %c64_i32_19 = arith.constant 64 : i32
        %29 = tpu.dynamic_rotate %20 by %c64_i32_19 dim 1 : vector<1x128xf32>, i32 -> vector<1x128xf32>
        %30 = arith.addf %26, %29 : vector<1x128xf32>
        %c96_i32 = arith.constant 96 : i32
        %31 = tpu.dynamic_rotate %19 by %c96_i32 dim 1 : vector<1x128xf32>, i32 -> vector<1x128xf32>
        %32 = arith.addf %28, %31 : vector<1x128xf32>
        %c96_i32_20 = arith.constant 96 : i32
        %33 = tpu.dynamic_rotate %20 by %c96_i32_20 dim 1 : vector<1x128xf32>, i32 -> vector<1x128xf32>
        %34 = arith.addf %30, %33 : vector<1x128xf32>
        %cst = arith.constant 6.250000e-02 : f32
        %35 = vector.broadcast %cst : f32 to vector<1x128xf32>
        %36 = arith.mulf %32, %35 : vector<1x128xf32>
        %cst_21 = arith.constant 6.250000e-02 : f32
        %37 = vector.broadcast %cst_21 : f32 to vector<1x128xf32>
        %38 = arith.mulf %34, %37 : vector<1x128xf32>
        %39 = arith.mulf %36, %36 : vector<1x128xf32>
        %40 = arith.subf %38, %39 : vector<1x128xf32>
        %cst_22 = arith.constant 0.000000e+00 : f32
        %41 = vector.broadcast %cst_22 : f32 to vector<1x128xf32>
        %42 = arith.maximumf %40, %41 : vector<1x128xf32>
        %cst_23 = arith.constant 9.99999974E-6 : f32
        %43 = vector.broadcast %cst_23 : f32 to vector<1x128xf32>
        %44 = arith.addf %42, %43 : vector<1x128xf32>
        %45 = math.rsqrt %44 : vector<1x128xf32>
        %46 = arith.mulf %21, %45 : vector<1x128xf32>
        %47 = arith.mulf %36, %46 : vector<1x128xf32>
        %48 = arith.subf %22, %47 : vector<1x128xf32>
        %c0_24 = arith.constant 0 : index
        %c0_25 = arith.constant 0 : index
        %49 = vector.load %arg10[%c0_24, %c0_25] : memref<1x128xf32, #tpu.memory_space<vmem>>, vector<1x128xf32>
        tpu.vector_store %arg10[%c0_24, %c0_25], %46 {strides = array<i32>} : memref<1x128xf32, #tpu.memory_space<vmem>>, vector<1x128xf32>,
        %c0_26 = arith.constant 0 : index
        %c0_27 = arith.constant 0 : index
        %50 = vector.load %arg11[%c0_26, %c0_27] : memref<1x128xf32, #tpu.memory_space<vmem>>, vector<1x128xf32>
        tpu.vector_store %arg11[%c0_26, %c0_27], %48 {strides = array<i32>} : memref<1x128xf32, #tpu.memory_space<vmem>>, vector<1x128xf32>,
      } else {
      }
      %10 = arith.index_cast %0 : i32 to index
      %c0 = arith.constant 0 : index
      %11 = vector.load %arg7[%10, %c0] : memref<4x128xf32, #tpu.memory_space<vmem>>, vector<4x128xf32>
      %c0_4 = arith.constant 0 : index
      %c0_5 = arith.constant 0 : index
      %12 = vector.load %arg10[%c0_4, %c0_5] : memref<1x128xf32, #tpu.memory_space<vmem>>, vector<1x128xf32>
      %13 = vector.broadcast %12 : vector<1x128xf32> to vector<4x128xf32>
      %14 = arith.mulf %11, %13 : vector<4x128xf32>
      %c0_6 = arith.constant 0 : index
      %c0_7 = arith.constant 0 : index
      %15 = vector.load %arg11[%c0_6, %c0_7] : memref<1x128xf32, #tpu.memory_space<vmem>>, vector<1x128xf32>
      %16 = vector.broadcast %15 : vector<1x128xf32> to vector<4x128xf32>
      %17 = arith.addf %14, %16 : vector<4x128xf32>
      %c0_8 = arith.constant 0 : index
      %c0_9 = arith.constant 0 : index
      %18 = vector.load %arg6[%c0_8, %c0_9] : memref<4x128xf32, #tpu.memory_space<vmem>>, vector<4x128xf32>
      tpu.vector_store %arg6[%c0_8, %c0_9], %17 {strides = array<i32>} : memref<4x128xf32, #tpu.memory_space<vmem>>, vector<4x128xf32>,
    } else {
    }
    return
  }
  func.func @transform_0(%arg0: i32, %arg1: i32) -> (i32, i32) {
    %c1_i32 = arith.constant 1 : i32
    %0 = arith.subi %c1_i32, %arg0 : i32
    %1 = arith.muli %arg1, %0 : i32
    %c0_i32 = arith.constant 0 : i32
    %2 = arith.muli %c0_i32, %arg0 : i32
    %3 = arith.addi %1, %2 : i32
    %c0_i32_0 = arith.constant 0 : i32
    %c0_i32_1 = arith.constant 0 : i32
    return %3, %c0_i32_0 : i32, i32
  }
  func.func @transform_1(%arg0: i32, %arg1: i32) -> (i32, i32) {
    %c1_i32 = arith.constant 1 : i32
    %0 = arith.subi %c1_i32, %arg0 : i32
    %1 = arith.muli %arg1, %0 : i32
    %c0_i32 = arith.constant 0 : i32
    %2 = arith.muli %c0_i32, %arg0 : i32
    %3 = arith.addi %1, %2 : i32
    %c0_i32_0 = arith.constant 0 : i32
    %c0_i32_1 = arith.constant 0 : i32
    return %3, %c0_i32_0 : i32, i32
  }
  func.func @transform_2(%arg0: i32, %arg1: i32) -> (i32, i32) {
    %c0_i32 = arith.constant 0 : i32
    %c0_i32_0 = arith.constant 0 : i32
    %c0_i32_1 = arith.constant 0 : i32
    return %c0_i32, %c0_i32_0 : i32, i32
  }
  func.func @transform_3(%arg0: i32, %arg1: i32) -> (i32, i32) {
    %c0_i32 = arith.constant 0 : i32
    %c0_i32_0 = arith.constant 0 : i32
    %c0_i32_1 = arith.constant 0 : i32
    return %c0_i32, %c0_i32_0 : i32, i32
  }
  func.func @transform_4(%arg0: i32, %arg1: i32) -> (i32, i32) {
    %0 = arith.muli %arg1, %arg0 : i32
    %c0_i32 = arith.constant 0 : i32
    %c0_i32_0 = arith.constant 0 : i32
    return %0, %c0_i32 : i32, i32
  }
}

</mosaic_0001>

<bundles_post_ra>
// kernel: tpu_custom_call.1
= control target key start
LH: loop header
LB: loop body
LE: loop exit
PB: predicated region body
PF: predicated region fallthrough
CT: control target
= control target key end

     0   :  { %9 = vsyncpa [#allocation8], 0  ;;  %s857_s0 = inlined_call_operand.hbm [shape: f32[4,128], index: 0, kind: input, shape index: {}]   ;;  %s858_s1 = inlined_call_operand.hbm [shape: f32[4,128], index: 1, kind: input, shape index: {}]   ;;  %s859_s2 = inlined_call_operand.vmem [shape: f32[1,128], index: 2, kind: input, shape index: {}]   ;;  %s860_s3 = inlined_call_operand.vmem [shape: f32[1,128], index: 3, kind: input, shape index: {}]   ;;  %s861_s4 = inlined_call_operand.hbm [shape: f32[4,128], index: 4, kind: output, shape index: {}]  }
   0x1   :  { %11 = vsyncpa [#allocation8 + $0x1], 0 }
   0x2   :  { %12 = vsyncpa [#allocation11], 0 }
   0x3   :  { %14 = vsyncpa [#allocation11 + $0x1], 0 }
   0x4   :  { %15 = vsyncpa [#allocation9], 0 }
   0x5   :  { %17 = vsyncpa [#allocation9 + $0x1], 0  ;;  %s731_s15 = smov 0   ;;  %s733_s16 = smov 0  }
   0x6   :  { %s735_s17 = smov 0  }
   0x7 LB: > { %s500_s18 = sadd.s32 4294967295, %s697_s17   ;;  %s501_s19 = sadd.s32 4294967294, %s697_s17   ;;  %s697_s17 = sphi %s735_s17, %s23_s17   ;;  %s693_s16 = sphi %s733_s16, %s869_s16   ;;  %s689_s15 = sphi %s731_s15, %s868_s15  }
   0x8   : > { %s35_s20 = sadd.s32 1, %s693_s16  ;;  %p540_p2 = scmp.lt.s32.totalorder %s697_s17, 2 }
   0x9   : > { %p37_p1 = scmp.ge.s32.totalorder %s35_s20, 2  ;;  %p541_p3 = scmp.eq.s32.totalorder %s697_s17, 0 }
   0xa   : > { %s699_s22 = smov [#allocation7]   ;;  %s581_s26 = scalar_lea.hbm %s857_s0, 64 }
   0xb   : > { %s871_s20 = smov (%p37_p1, %s35_s20), 0  ;;  %p754_p4 = pnand %p541_p3, %p540_p2 }
   0xc   : > { %s202_s23 = sshll.u32 %s699_s22, 4  ;;  %p582_p6 = scmp.ne.s32.totalorder %s857_s0, %s581_s26  ;;  %s203_s23 = int_to_ptr.vmem [resolvable:$true] %s202_s23 }
   0xd   : > { %p583_p7 = pneg %p754_p4  ;;  %p588_p10 = scmp.lt.u32.totalorder %s581_s26, %s857_s0 }
   0xf   : > { %p584_p8 = pnand %p583_p7, %p582_p6 }
  0x11   : > { %p585_p9 = pneg %p584_p8 }
  0x13   : > { %p590_p11 = pnand %p588_p10, %p585_p9 }
  0x15   : > { %593 = shalt.err (!%p590_p11)
}
  0x16   : > { %s594_s5 = scalar_lea.vmem %s203_s23, 64  ;;  %s601_s6 = scalar_lea.vmem %s203_s23, 128 }
  0x17   : > { %p595_p12 = scmp.ne.s32.totalorder %s203_s23, %s594_s5  ;;  %p602_p2 = scmp.lt.s32.totalorder %s203_s23, %s203_s23 }
  0x18   : > { %p603_p3 = scmp.lt.s32.totalorder %s601_s6, %s594_s5 }
  0x19   : > { %p597_p13 = pnand %p595_p12, %p583_p7 }
  0x1a   : > { %p604_p0 = por %p603_p3, %p602_p2 }
  0x1b   : > { %p598_p1 = pneg %p597_p13 }
  0x1d   : > { %p605_p5 = pnand %p604_p0, %p598_p1 }
  0x1f   : > { %608 = shalt.err (!%p605_p5)
}
  0x20   : > { %532 = dma.hbm_to_vmem [thread:$0]  (!%p754_p4), %s857_s0, 64, %s203_s23, [#allocation8]  }
  0x21   : > { %p227_p6 = scmp.lt.s32.totalorder %s697_s17, 3  ;;  %s700_s9 = smov [#allocation10]  }
  0x22   : > { %s222_s10 = sshll.u32 %s700_s9, 4  ;;  %p863_p8 = scmp.ge.s32.totalorder %s697_s17, 1  ;;  %s223_s10 = int_to_ptr.vmem [resolvable:$true] %s222_s10 }
  0x23   : > { %s609_s14 = scalar_lea.hbm %s858_s1, 64 }
  0x24   : > { %p784_p9 = pnand %p863_p8, %p227_p6  ;;  %p610_p0 = scmp.ne.s32.totalorder %s858_s1, %s609_s14 }
  0x25   : > { %p616_p11 = scmp.lt.u32.totalorder %s609_s14, %s858_s1 }
  0x26   : > { %s864_s11 = scalar_select %p784_p9, 1, 0 }
  0x27   : > { %p612_p5 = pnand %p610_p0, %p583_p7 }
  0x29   : > { %p613_p10 = pneg %p612_p5 }
  0x2b   : > { %p618_p12 = pnand %p616_p11, %p613_p10 }
  0x2d   : > { %621 = shalt.err (!%p618_p12)
}
  0x2e   : > { %s622_s26 = scalar_lea.vmem %s223_s10, 64  ;;  %s629_s27 = scalar_lea.vmem %s223_s10, 128 }
  0x2f   : > { %p623_p13 = scmp.ne.s32.totalorder %s223_s10, %s622_s26  ;;  %p630_p3 = scmp.lt.s32.totalorder %s223_s10, %s223_s10 }
  0x30   : > { %p631_p6 = scmp.lt.s32.totalorder %s629_s27, %s622_s26 }
  0x31   : > { %p625_p1 = pnand %p623_p13, %p583_p7 }
  0x32   : > { %p632_p8 = por %p631_p6, %p630_p3 }
  0x33   : > { %p626_p2 = pneg %p625_p1 }
  0x35   : > { %p633_p9 = pnand %p632_p8, %p626_p2 }
  0x37   : > { %636 = shalt.err (!%p633_p9)
}
  0x38   : > { %535 = dma.hbm_to_vmem [thread:$0]  (!%p754_p4), %s858_s1, 64, %s223_s10, [#allocation11]  }
  0x39   : > { %p865_p0 = scmp.ne.s32.totalorder %s864_s11, 0 }
  0x3a   : > { %p543_p5 = scmp.eq.s32.totalorder (!%p865_p0), %s500_s18, 0 }
  0x3b   : > { %231 = sbr.rel (%p865_p0) target bundleno = 282 (0x11a), region = 36 }
  0x42   : > { %676 = dma.done.wait (%p543_p5), [#allocation8], 64  }
  0x43   : > { %678 = vsyncadd (%p543_p5), [#allocation8], 4294967232 }
  0x44   : > { %680 = dma.done.wait (%p543_p5), [#allocation11], 64  }
  0x45   : > { %682 = vsyncadd (%p543_p5), [#allocation11], 4294967232  ;;  %p509_p7 = scmp.ne.s32.totalorder %s689_s15, 0 }
  0x46   : > { %v286_v0 = vld [vmem:[#allocation7] sm:$0xf] (!%p509_p7)  ;;  %v287_v1 = vld [vmem:[#allocation10] sm:$0xf] (!%p509_p7)  ;;  %vm298_vm0 = vcmask (!%p509_p7), 1043456   ;;  %v701_v2 = vmov (!%p509_p7), 0.0  }
  0x47   : > { %285 = sbr.rel (%p509_p7) target bundleno = 91 (0x5b), region = 48  ;;  %295 = vst [vmem:[#allocation3] sm:$0x1] (!%p509_p7), %v701_v2  ;;  %296 = vst [vmem:[#allocation4] sm:$0x1] (!%p509_p7), %v701_v2  ;;  %v288_v3 = vadd.f32 (!%p509_p7), %v287_v1, %v286_v0 }
  0x49   : > { %290 = vst [vmem:[#allocation2] sm:$0xf] (!%p509_p7), %v288_v3  ;;  %v299_v4 = vsel (!%p509_p7), %vm298_vm0, %v288_v3, 0.0  ;;  %v309_v5 = vmul.f32 (!%p509_p7), %v288_v3, %v288_v3 }
  0x4a   : > { %v300_v6 = vrot.slane (!%p509_p7), %v299_v4, 4 }
  0x4b   : > { %v310_v7 = vsel (!%p509_p7), %vm298_vm0, %v309_v5, 0.0 }
  0x4c   : > { %v301_v8 = vadd.f32 (!%p509_p7), %v300_v6, %v299_v4  ;;  %v311_v9 = vrot.slane (!%p509_p7), %v310_v7, 4 }
  0x4e   : > { %v302_v10 = vrot.slane %v301_v8, 2  ;;  %v312_v11 = vadd.f32 %v311_v9, %v310_v7  ;;  %v297_v16 = vld [vmem:[#allocation3] sm:$0x1]  ;;  %v308_v19 = vld [vmem:[#allocation4] sm:$0x1] }
  0x50   : > { %v303_v12 = vadd.f32 %v302_v10, %v301_v8  ;;  %v313_v13 = vrot.slane %v312_v11, 2 }
  0x52   : > { %v304_v14 = vrot.slane %v303_v12, 1  ;;  %v314_v15 = vadd.f32 %v313_v13, %v312_v11 }
  0x54   : > { %v305_v17 = vadd.f32 %v304_v14, %v303_v12  ;;  %v315_v18 = vrot.slane %v314_v15, 1 }
  0x56   : > { %v306_v20 = vadd.f32 %v305_v17, %v297_v16  ;;  %v316_v21 = vadd.f32 %v315_v18, %v314_v15 }
  0x58   : > { %307 = vst [vmem:[#allocation3] sm:$0x1] %v306_v20  ;;  %v317_v22 = vadd.f32 %v316_v21, %v308_v19 }
  0x5a   : > { %318 = vst [vmem:[#allocation4] sm:$0x1] %v317_v22 }
  0x5b PF: > { %p510_p4 = scmp.ne.s32.totalorder %s689_s15, 1 }
  0x5c   : > { %s702_s21 = smov (!%p510_p4), 64   ;;  %s703_s30 = smov (!%p510_p4), 32   ;;  %v329_v43 = vld [vmem:[%s859_s2] sm:$0x1] (!%p510_p4) }
  0x5d   : > { %322 = sbr.rel (%p510_p4) target bundleno = 259 (0x103), region = 56  ;;  %s704_s5 = smov (!%p510_p4), 96   ;;  %v330_v46 = vld [vmem:[%s860_s3] sm:$0x1] (!%p510_p4) }
  0x5e   : > { %v362_v49 = vld [vmem:[#allocation2] sm:$0xf] (!%p510_p4) }
  0x5f   : > { %v327_v23 = vld [vmem:[#allocation3] sm:$0x1] (!%p510_p4) }
  0x60   : > { %337 = vrot.lane.b32.xlu1 (!%p510_p4), %v327_v23, %s702_s21  ;;  %331 = vrot.lane.b32.xlu0 (!%p510_p4), %v327_v23, %s703_s30 }
  0x61   : > { %v328_v24 = vld [vmem:[#allocation4] sm:$0x1] (!%p510_p4) }
  0x64   : > { %340 = vrot.lane.b32.xlu1 %v328_v24, %s702_s21  ;;  %334 = vrot.lane.b32.xlu0 %v328_v24, %s703_s30 }
  0x68   : > { %346 = vrot.lane.b32.xlu1 %v328_v24, %s704_s5  ;;  %343 = vrot.lane.b32.xlu0 %v327_v23, %s704_s5 }
  0xd2   : > { %v338_v25 = vpop.permute.xlu1 %337  ;;  %v332_v26 = vpop.permute.xlu0 %331 }
  0xd3   : > { %v333_v27 = vadd.f32 %v332_v26, %v327_v23 }
  0xd5   : > { %v339_v32 = vadd.f32 %v338_v25, %v333_v27 }
  0xd6   : > { %v341_v28 = vpop.permute.xlu1 %340  ;;  %v335_v29 = vpop.permute.xlu0 %334 }
  0xd7   : > { %v336_v30 = vadd.f32 %v335_v29, %v328_v24 }
  0xd9   : > { %v342_v31 = vadd.f32 %v341_v28, %v336_v30 }
  0xda   : > { %v347_v33 = vpop.permute.xlu1 %346  ;;  %v344_v34 = vpop.permute.xlu0 %343 }
  0xdb   : > { %v348_v35 = vadd.f32 %v347_v33, %v342_v31  ;;  %v345_v36 = vadd.f32 %v344_v34, %v339_v32 }
  0xdd   : > { %v349_v37 = vmul.f32 0.0625, %v345_v36  ;;  %v350_v38 = vmul.f32 0.0625, %v348_v35 }
  0xdf   : > { %v351_v39 = vmul.f32 %v349_v37, %v349_v37 }
  0xe1   : > { %v352_v40 = vsub.f32 %v350_v38, %v351_v39 }
  0xe3   : > { %v353_v41 = vmax.f32 %v352_v40, 0.0 }
  0xe5   : > { %v354_v42 = vadd.f32 1e-05, %v353_v41 }
  0xe7   : > { %579 = vrsqrt.f32 %v354_v42 }
  0xf1   : > { %v580_v44 = vpop.eup %579 }
  0xf2   : > { %v356_v45 = vmul.f32 %v580_v44, %v329_v43 }
  0xf4   : > { %v357_v47 = vmul.f32 %v356_v45, %v349_v37  ;;  %359 = vst [vmem:[#allocation5] sm:$0x1] %v356_v45 }
  0xf6   : > { %v358_v48 = vsub.f32 %v330_v46, %v357_v47 }
  0xf8   : > { %360 = vst [vmem:[#allocation6] sm:$0x1] %v358_v48 }
  0xfb   : > { %v511_v50 = vld [vmem:[#allocation5] ss:$0 sm:$0xff] }
  0xfc   : > { %v370_v51 = vmul.f32 %v511_v50, %v362_v49 }
  0xff   : > { %v512_v52 = vld [vmem:[#allocation6] ss:$0 sm:$0xff] }
 0x100   : > { %v378_v53 = vadd.f32 %v512_v52, %v370_v51 }
 0x102   : > { %379 = vst [vmem:[#allocation12] sm:$0xf] %v378_v53 }
 0x103 PF: > { %p822_p9 = scmp.eq.s32.totalorder %s500_s18, 1  ;;  %s705_s10 = smov [#allocation12]  }
 0x104   : > { %s395_s11 = sshll.u32 %s705_s10, 4  ;;  %s396_s11 = int_to_ptr.vmem [resolvable:$true] %s395_s11 }
 0x105   : > { %s637_s12 = scalar_lea.vmem %s396_s11, 64  ;;  %s643_s13 = scalar_lea.vmem %s396_s11, 128 }
 0x106   : > { %p638_p10 = scmp.ne.s32.totalorder %s396_s11, %s637_s12  ;;  %p644_p13 = scmp.lt.s32.totalorder %s396_s11, %s396_s11 }
 0x107   : > { %p645_p1 = scmp.lt.s32.totalorder %s643_s13, %s637_s12 }
 0x108   : > { %p639_p11 = pnand %p638_p10, %p822_p9 }
 0x109   : > { %p646_p2 = por %p645_p1, %p644_p13 }
 0x10a   : > { %p640_p12 = pneg %p639_p11 }
 0x10c   : > { %p647_p3 = pnand %p646_p2, %p640_p12 }
 0x10e   : > { %650 = shalt.err (!%p647_p3)
}
 0x10f   : > { %s651_s22 = scalar_lea.hbm %s861_s4, 64 }
 0x110   : > { %p652_p6 = scmp.ne.s32.totalorder %s861_s4, %s651_s22  ;;  %p657_p5 = scmp.lt.u32.totalorder %s651_s22, %s861_s4 }
 0x112   : > { %p653_p8 = pnand %p652_p6, %p822_p9 }
 0x114   : > { %p654_p0 = pneg %p653_p8 }
 0x116   : > { %p659_p7 = pnand %p657_p5, %p654_p0 }
 0x118   : > { %662 = shalt.err (!%p659_p7)
}
 0x119   : > { %526 = dma.vmem_to_hbm [thread:$0]  (%p822_p9), %s396_s11, 64, %s861_s4, [#allocation9]  }
 0x11a PF: > { %p547_p4 = scmp.eq.s32.totalorder %s501_s19, 1  ;;  %p867_p10 = scmp.ge.s32.totalorder %s697_s17, 2 }
 0x11c   : > { %p537_p11 = pnand %p547_p4, %p867_p10 }
 0x11e   : > { %684 = dma.done.wait (!%p537_p11), [#allocation9], 64  }
 0x11f   : > { %686 = vsyncadd (!%p537_p11), [#allocation9], 4294967232  ;;  %s23_s17 = sadd.s32 1, %s697_s17   ;;  %s868_s15 = smov %s693_s16 }
 0x120   : > { %p20_p12 = scmp.ge.s32.totalorder %s23_s17, 4   ;;  %s869_s16 = smov %s871_s20 }
 0x122   :  { %22 = sbr.rel (!%p20_p12) target bundleno = 7 (0x7), region = 112 }
 0x129   :  { %413 = vsyncpa [#allocation8], 1 }
 0x12a   :  { %415 = vsyncpa [#allocation8 + $0x1], 1 }
 0x12b   :  { %416 = vsyncpa [#allocation11], 1 }
 0x12c   :  { %418 = vsyncpa [#allocation11 + $0x1], 1 }
 0x12d   :  { %419 = vsyncpa [#allocation9], 1 }
 0x12e   :  { %421 = vsyncpa [#allocation9 + $0x1], 1 }

</bundles_post_ra>
